<compile_context>
chip_gen: v7x
topology: tpu7x:2x2x1
jax: 0.10.0
libtpu: 0.0.40
codegen_flags: <defaults>
</compile_context>

<pallas_src>
import math
from functools import partial

import jax
import jax.numpy as jnp
from jax import lax
from jax.experimental import pallas as pl
from jax.experimental.pallas import tpu as pltpu


def _vector_estimation_loss_kernel(
    pos_ref, vec_ref, out_ref, *,
    n_points, n_anchors, k, eps, cos_eps, power_iters,
):
    """Per-graph loss.

    pos_ref: (1, 3, N)  coordinates, channels-first (N on lanes).
    vec_ref: (1, 3, M)  predicted vectors of the first M points (the only rows the
                        torch reference reads via vec_pred[index[0, :]]).
    out_ref: (1, 1, 1)  per-graph loss.
    """
    N, M, K = n_points, n_anchors, k
    f32 = jnp.float32

    pos = pos_ref[0].astype(f32)                              # (3, N)
    px, py, pz = pos[0:1, :], pos[1:2, :], pos[2:3, :]        # (1, N) each

    lane_n = lax.broadcasted_iota(jnp.int32, (1, N), 1)       # (1, N)
    row_m = lax.broadcasted_iota(jnp.int32, (M, 1), 0)        # (M, 1)
    e3 = lax.broadcasted_iota(jnp.int32, (1, 3), 1)           # (1, 3)
    ex = (e3 == 0).astype(f32)
    ey = (e3 == 1).astype(f32)
    ez = (e3 == 2).astype(f32)

    # ---------------- farthest point sampling (lane-dense over N) ----------------
    # TODO(synk): torch_cluster.fps starts from a random point; we start
    # deterministically at index 0 (otherwise identical semantics).
    sel0 = (lane_n == 0).astype(f32)
    lx0 = jnp.sum(sel0 * px, axis=1, keepdims=True)           # (1, 1)
    ly0 = jnp.sum(sel0 * py, axis=1, keepdims=True)
    lz0 = jnp.sum(sel0 * pz, axis=1, keepdims=True)
    anchors0 = jnp.where(row_m == 0, lx0 * ex + ly0 * ey + lz0 * ez,
                         jnp.zeros((M, 3), f32))              # (M, 3)
    min_dist0 = jnp.full((1, N), 1e30, dtype=f32)

    def fps_body(m, carry):
        min_dist, lx, ly, lz, anch = carry
        d = (px - lx) ** 2 + (py - ly) ** 2 + (pz - lz) ** 2  # (1, N)
        min_dist = jnp.minimum(min_dist, d)
        far = jnp.max(min_dist, axis=1, keepdims=True)        # (1, 1)
        sel = jnp.max(jnp.where(min_dist == far, lane_n, -1),
                      axis=1, keepdims=True)                  # (1, 1) int32
        sm = (lane_n == sel).astype(f32)                      # (1, N)
        nlx = jnp.sum(sm * px, axis=1, keepdims=True)
        nly = jnp.sum(sm * py, axis=1, keepdims=True)
        nlz = jnp.sum(sm * pz, axis=1, keepdims=True)
        anch = jnp.where(row_m == m, nlx * ex + nly * ey + nlz * ez, anch)
        return (min_dist, nlx, nly, nlz, anch)

    _, _, _, _, anchors = lax.fori_loop(
        1, M, fps_body, (min_dist0, lx0, ly0, lz0, anchors0))  # anchors: (M, 3)

    # ---------------- kNN (anchors -> all points): k smallest distances ----------
    # The per-row constant ||a||^2 does not change each row's top-k selection, so
    # it is dropped; d2 doubles as the top-k work buffer (no extra copy).
    p_sq = px * px + py * py + pz * pz                        # (1, N)
    cross = jnp.dot(anchors, pos, preferred_element_type=f32)  # (M, N) on the MXU
    d2 = p_sq - 2.0 * cross                                   # (M, N)

    def topk_body(_, carry):
        w, d2w = carry
        row_min = jnp.min(d2w, axis=1, keepdims=True)         # (M, 1)
        col_iota = lax.broadcasted_iota(jnp.int32, (M, N), 1)
        sel_idx = jnp.min(jnp.where(d2w == row_min, col_iota, N),
                          axis=1, keepdims=True)              # (M, 1)
        sel_oh = (col_iota == sel_idx).astype(f32)            # (M, N)
        return (w + sel_oh, jnp.where(sel_oh > 0.0, jnp.float32(1e30), d2w))

    W, _ = lax.fori_loop(0, K, topk_body,
                         (jnp.zeros((M, N), f32), d2), unroll=True)  # (M, N) 0/1

    # ---------------- neighborhood PCA via first/second moments ------------------
    # One MXU contraction over N gives all moments, lane-dense over M.
    p_aug = jnp.concatenate(
        [px, py, pz, px * px, px * py, px * pz, py * py, py * pz, pz * pz],
        axis=0)                                               # (9, N)
    s = lax.dot_general(p_aug, W, (((1,), (1,)), ((), ())),
                        preferred_element_type=f32)           # (9, M)
    kf = float(K)
    mx, my, mz = s[0:1, :] / kf, s[1:2, :] / kf, s[2:3, :] / kf
    cxx = s[3:4, :] - kf * mx * mx                            # centered scatter
    cxy = s[4:5, :] - kf * mx * my                            # matrix entries,
    cxz = s[5:6, :] - kf * mx * mz                            # each (1, M)
    cyy = s[6:7, :] - kf * my * my
    cyz = s[7:8, :] - kf * my * mz
    czz = s[8:9, :] - kf * mz * mz

    # Power iteration for the top eigenvector (== V[:, :, 0] of torch.pca_lowrank
    # up to sign; sign is cancelled by abs() below).
    # TODO(synk): torch.pca_lowrank uses a randomized projection; we use a fixed
    # start vector, which may pick an arbitrary direction for degenerate clouds.
    def pow_body(_, v):
        vx, vy, vz = v
        wx = cxx * vx + cxy * vy + cxz * vz
        wy = cxy * vx + cyy * vy + cyz * vz
        wz = cxz * vx + cyz * vy + czz * vz
        inv = lax.rsqrt(wx * wx + wy * wy + wz * wz + 1e-30)
        return (wx * inv, wy * inv, wz * inv)

    vx, vy, vz = lax.fori_loop(
        0, power_iters, pow_body,
        (jnp.full((1, M), 0.6, f32),
         jnp.full((1, M), 0.5, f32),
         jnp.full((1, M), 0.4, f32)))                         # (1, M) each

    # ---------------- cosine-similarity loss ----------------
    # In the torch code index[0, :] holds the kNN query indices 0..M-1, each
    # repeated k times, so vec_pred[index[0, :]] selects rows 0..M-1 of vec_pred
    # and the mean over the M*k edges equals the mean over the M anchors.
    vp = vec_ref[0].astype(f32)                               # (3, M)
    ax, ay, az = vp[0:1, :], vp[1:2, :], vp[2:3, :]
    dotp = ax * vx + ay * vy + az * vz
    n1 = jnp.sqrt(ax * ax + ay * ay + az * az)
    n2 = jnp.sqrt(vx * vx + vy * vy + vz * vz)
    cosv = dotp / jnp.maximum(n1 * n2, cos_eps)               # nn.CosineSimilarity
    logt = jnp.log(jnp.abs(cosv) + eps)                       # (1, M)
    loss = -jnp.sum(logt, axis=1, keepdims=True) * (1.0 / M)  # (1, 1)
    out_ref[0] = loss.astype(out_ref.dtype)


def vector_estimation_loss(x, pos, *, fps_ratio=0.1, k=20, eps=1e-6,
                           power_iters=32):
    """Forward pass of VectorEstimationLoss over B equal-size graphs.

    x:   (B, N, C) with C >= 6 ; vec_pred = x[..., 3:6]
    pos: (B, N, 3)
    returns scalar loss = sum_b loss_b / B
    """
    B, N, _ = pos.shape
    M = max(1, int(math.ceil(fps_ratio * N)))      # number of fps anchors
    assert k <= N, "k must be <= number of points"

    # channels-first (lane-dense) layouts; only the first M rows of vec_pred are
    # ever read by the loss, so slice before the DMA.
    pos_t = jnp.transpose(pos.astype(jnp.float32), (0, 2, 1))               # (B, 3, N)
    vec_t = jnp.transpose(x[..., 3:6].astype(jnp.float32), (0, 2, 1))[:, :, :M]  # (B, 3, M)

    kernel = partial(
        _vector_estimation_loss_kernel,
        n_points=N, n_anchors=M, k=int(k),
        eps=float(eps), cos_eps=1e-8, power_iters=int(power_iters),
    )

    # Rough live-footprint estimate (d2/W/cross (M,N), pos + p_aug rows, small
    # per-anchor state), clamped to a safe scoped-VMEM range.
    # TODO(synk): for very large N (e.g. >= 8K on v7x) add a second grid axis that
    # tiles the anchor dimension so the (M, N) buffers stay within VMEM.
    vmem_est = 4 * (4 * M * N + 16 * N + 64 * M) + (2 << 20)
    vmem_limit = int(min(max(vmem_est, 32 << 20), 100 << 20))

    per_graph = pl.pallas_call(
        kernel,
        out_shape=jax.ShapeDtypeStruct((B, 1, 1), jnp.float32),
        grid_spec=pltpu.PrefetchScalarGridSpec(
            num_scalar_prefetch=0,
            grid=(B,),
            in_specs=[
                pl.BlockSpec((1, 3, N), lambda b: (b, 0, 0)),
                pl.BlockSpec((1, 3, M), lambda b: (b, 0, 0)),
            ],
            out_specs=pl.BlockSpec((1, 1, 1), lambda b: (b, 0, 0)),
        ),
        compiler_params=pltpu.CompilerParams(
            dimension_semantics=("parallel",),
            vmem_limit_bytes=vmem_limit),
    )(pos_t, vec_t)

    losses = per_graph[:, 0, 0]
    return jnp.sum(losses) / B          # == sum(loss) / len(loss)


if __name__ == "__main__":
    # deterministic synthetic "graph batch": B graphs, N points each, C features
    cfg = {"vector_estimation_loss": {"fps_ratio": 0.125, "k": 8, "eps": 1e-6}}
    lc = cfg["vector_estimation_loss"]

    key = jax.random.PRNGKey(0)
    k1, k2 = jax.random.split(key)
    B, N, C = 2, 64, 7
    pos = jax.random.normal(k1, (B, N, 3), dtype=jnp.float32)
    x = jax.random.normal(k2, (B, N, C), dtype=jnp.float32)

    loss = vector_estimation_loss(
        x, pos, fps_ratio=lc["fps_ratio"], k=lc["k"], eps=lc["eps"])
    jax.block_until_ready(loss)
    assert loss.shape == () and jnp.isfinite(loss)
    print("KERNEL_OK")
</pallas_src>

<mosaic_0001>
module attributes {stable_mosaic.version = 11 : i64} {
  func.func @_vector_estimation_loss_kernel(%arg0: i32, %arg1: memref<1x3x64xf32, #tpu.memory_space<vmem>>, %arg2: memref<1x3x8xf32, #tpu.memory_space<vmem>>, %arg3: memref<1x1x1xf32, #tpu.memory_space<vmem>>) attributes {dimension_semantics = [#tpu.dimension_semantics<parallel>], iteration_bounds = array<i64: 2>, scalar_prefetch = 0 : i64, scratch_operands = 0 : i64, tpu.core_type = #tpu.core_type<tc>, window_params = [{transform_indices = @transform_0, window_bounds = array<i64: 1, 3, 64>}, {transform_indices = @transform_1, window_bounds = array<i64: 1, 3, 8>}, {transform_indices = @transform_2, window_bounds = array<i64: 1, 1, 1>}]} {
    %c0 = arith.constant 0 : index
    %c0_0 = arith.constant 0 : index
    %c0_1 = arith.constant 0 : index
    %0 = vector.load %arg1[%c0, %c0_0, %c0_1] : memref<1x3x64xf32, #tpu.memory_space<vmem>>, vector<1x3x64xf32>
    %1 = vector.shape_cast %0 : vector<1x3x64xf32> to vector<3x64xf32>
    %2 = vector.extract_strided_slice %1 {offsets = [0, 0], sizes = [1, 64], strides = [1, 1]} : vector<3x64xf32> to vector<1x64xf32>
    %3 = vector.extract_strided_slice %1 {offsets = [1, 0], sizes = [1, 64], strides = [1, 1]} : vector<3x64xf32> to vector<1x64xf32>
    %4 = vector.extract_strided_slice %1 {offsets = [2, 0], sizes = [1, 64], strides = [1, 1]} : vector<3x64xf32> to vector<1x64xf32>
    %5 = tpu.iota {dimensions = array<i32: 1>} : vector<1x64xi32>
    %6 = tpu.iota {dimensions = array<i32: 0>} : vector<8x1xi32>
    %7 = tpu.iota {dimensions = array<i32: 1>} : vector<1x3xi32>
    %c0_i32 = arith.constant 0 : i32
    %8 = vector.broadcast %c0_i32 : i32 to vector<1x3xi32>
    %9 = arith.cmpi eq, %7, %8 : vector<1x3xi32>
    %10 = arith.extui %9 : vector<1x3xi1> to vector<1x3xi32>
    %11 = arith.sitofp %10 : vector<1x3xi32> to vector<1x3xf32>
    %c1_i32 = arith.constant 1 : i32
    %12 = vector.broadcast %c1_i32 : i32 to vector<1x3xi32>
    %13 = arith.cmpi eq, %7, %12 : vector<1x3xi32>
    %14 = arith.extui %13 : vector<1x3xi1> to vector<1x3xi32>
    %15 = arith.sitofp %14 : vector<1x3xi32> to vector<1x3xf32>
    %c2_i32 = arith.constant 2 : i32
    %16 = vector.broadcast %c2_i32 : i32 to vector<1x3xi32>
    %17 = arith.cmpi eq, %7, %16 : vector<1x3xi32>
    %18 = arith.extui %17 : vector<1x3xi1> to vector<1x3xi32>
    %19 = arith.sitofp %18 : vector<1x3xi32> to vector<1x3xf32>
    %c0_i32_2 = arith.constant 0 : i32
    %20 = vector.broadcast %c0_i32_2 : i32 to vector<1x64xi32>
    %21 = arith.cmpi eq, %5, %20 : vector<1x64xi32>
    %22 = arith.extui %21 : vector<1x64xi1> to vector<1x64xi32>
    %23 = arith.sitofp %22 : vector<1x64xi32> to vector<1x64xf32>
    %24 = arith.mulf %23, %2 : vector<1x64xf32>
    %cst = arith.constant dense<0.000000e+00> : vector<1xf32>
    %25 = vector.multi_reduction <add>, %24, %cst [1] : vector<1x64xf32> to vector<1xf32>
    %26 = vector.shape_cast %25 : vector<1xf32> to vector<1x1xf32>
    %27 = arith.mulf %23, %3 : vector<1x64xf32>
    %cst_3 = arith.constant dense<0.000000e+00> : vector<1xf32>
    %28 = vector.multi_reduction <add>, %27, %cst_3 [1] : vector<1x64xf32> to vector<1xf32>
    %29 = vector.shape_cast %28 : vector<1xf32> to vector<1x1xf32>
    %30 = arith.mulf %23, %4 : vector<1x64xf32>
    %cst_4 = arith.constant dense<0.000000e+00> : vector<1xf32>
    %31 = vector.multi_reduction <add>, %30, %cst_4 [1] : vector<1x64xf32> to vector<1xf32>
    %32 = vector.shape_cast %31 : vector<1xf32> to vector<1x1xf32>
    %c0_i32_5 = arith.constant 0 : i32
    %33 = vector.broadcast %c0_i32_5 : i32 to vector<8x1xi32>
    %34 = arith.cmpi eq, %6, %33 : vector<8x1xi32>
    %35 = vector.broadcast %26 : vector<1x1xf32> to vector<1x3xf32>
    %36 = arith.mulf %35, %11 : vector<1x3xf32>
    %37 = vector.broadcast %29 : vector<1x1xf32> to vector<1x3xf32>
    %38 = arith.mulf %37, %15 : vector<1x3xf32>
    %39 = arith.addf %36, %38 : vector<1x3xf32>
    %40 = vector.broadcast %32 : vector<1x1xf32> to vector<1x3xf32>
    %41 = arith.mulf %40, %19 : vector<1x3xf32>
    %42 = arith.addf %39, %41 : vector<1x3xf32>
    %cst_6 = arith.constant 0.000000e+00 : f32
    %43 = vector.broadcast %cst_6 : f32 to vector<8x3xf32>
    %44 = vector.shape_cast %34 : vector<8x1xi1> to vector<8x1xi1>
    %45 = vector.broadcast %44 : vector<8x1xi1> to vector<8x3xi1>
    %46 = vector.shape_cast %42 : vector<1x3xf32> to vector<1x3xf32>
    %47 = vector.broadcast %46 : vector<1x3xf32> to vector<8x3xf32>
    %48 = arith.select %45, %47, %43 : vector<8x3xi1>, vector<8x3xf32>
    %cst_7 = arith.constant 1.000000e+30 : f32
    %49 = vector.broadcast %cst_7 : f32 to vector<1x64xf32>
    %c1_i32_8 = arith.constant 1 : i32
    %c7_i32 = arith.constant 7 : i32
    %50 = arith.addi %c1_i32_8, %c7_i32 : i32
    %c1_i32_9 = arith.constant 1 : i32
    %51:5 = scf.for %arg4 = %c1_i32_8 to %50 step %c1_i32_9 iter_args(%arg5 = %49, %arg6 = %26, %arg7 = %29, %arg8 = %32, %arg9 = %48) -> (vector<1x64xf32>, vector<1x1xf32>, vector<1x1xf32>, vector<1x1xf32>, vector<8x3xf32>)  : i32 {
      %298 = vector.broadcast %arg6 : vector<1x1xf32> to vector<1x64xf32>
      %299 = arith.subf %2, %298 : vector<1x64xf32>
      %300 = arith.mulf %299, %299 : vector<1x64xf32>
      %301 = vector.broadcast %arg7 : vector<1x1xf32> to vector<1x64xf32>
      %302 = arith.subf %3, %301 : vector<1x64xf32>
      %303 = arith.mulf %302, %302 : vector<1x64xf32>
      %304 = arith.addf %300, %303 : vector<1x64xf32>
      %305 = vector.broadcast %arg8 : vector<1x1xf32> to vector<1x64xf32>
      %306 = arith.subf %4, %305 : vector<1x64xf32>
      %307 = arith.mulf %306, %306 : vector<1x64xf32>
      %308 = arith.addf %304, %307 : vector<1x64xf32>
      %309 = arith.minimumf %arg5, %308 : vector<1x64xf32>
      %cst_83 = arith.constant dense<0xFF800000> : vector<1xf32>
      %310 = vector.multi_reduction <maximumf>, %309, %cst_83 [1] : vector<1x64xf32> to vector<1xf32>
      %311 = vector.shape_cast %310 : vector<1xf32> to vector<1x1xf32>
      %312 = vector.broadcast %311 : vector<1x1xf32> to vector<1x64xf32>
      %313 = arith.cmpf oeq, %309, %312 : vector<1x64xf32>
      %c-1_i32 = arith.constant -1 : i32
      %314 = vector.broadcast %c-1_i32 : i32 to vector<1x64xi32>
      %315 = arith.select %313, %5, %314 : vector<1x64xi1>, vector<1x64xi32>
      %cst_84 = arith.constant dense<-2147483648> : vector<1xi32>
      %316 = vector.multi_reduction <maxsi>, %315, %cst_84 [1] : vector<1x64xi32> to vector<1xi32>
      %317 = vector.shape_cast %316 : vector<1xi32> to vector<1x1xi32>
      %318 = vector.broadcast %317 : vector<1x1xi32> to vector<1x64xi32>
      %319 = arith.cmpi eq, %5, %318 : vector<1x64xi32>
      %320 = arith.extui %319 : vector<1x64xi1> to vector<1x64xi32>
      %321 = arith.sitofp %320 : vector<1x64xi32> to vector<1x64xf32>
      %322 = arith.mulf %321, %2 : vector<1x64xf32>
      %cst_85 = arith.constant dense<0.000000e+00> : vector<1xf32>
      %323 = vector.multi_reduction <add>, %322, %cst_85 [1] : vector<1x64xf32> to vector<1xf32>
      %324 = vector.shape_cast %323 : vector<1xf32> to vector<1x1xf32>
      %325 = arith.mulf %321, %3 : vector<1x64xf32>
      %cst_86 = arith.constant dense<0.000000e+00> : vector<1xf32>
      %326 = vector.multi_reduction <add>, %325, %cst_86 [1] : vector<1x64xf32> to vector<1xf32>
      %327 = vector.shape_cast %326 : vector<1xf32> to vector<1x1xf32>
      %328 = arith.mulf %321, %4 : vector<1x64xf32>
      %cst_87 = arith.constant dense<0.000000e+00> : vector<1xf32>
      %329 = vector.multi_reduction <add>, %328, %cst_87 [1] : vector<1x64xf32> to vector<1xf32>
      %330 = vector.shape_cast %329 : vector<1xf32> to vector<1x1xf32>
      %331 = vector.broadcast %arg4 : i32 to vector<8x1xi32>
      %332 = arith.cmpi eq, %6, %331 : vector<8x1xi32>
      %333 = vector.broadcast %324 : vector<1x1xf32> to vector<1x3xf32>
      %334 = arith.mulf %333, %11 : vector<1x3xf32>
      %335 = vector.broadcast %327 : vector<1x1xf32> to vector<1x3xf32>
      %336 = arith.mulf %335, %15 : vector<1x3xf32>
      %337 = arith.addf %334, %336 : vector<1x3xf32>
      %338 = vector.broadcast %330 : vector<1x1xf32> to vector<1x3xf32>
      %339 = arith.mulf %338, %19 : vector<1x3xf32>
      %340 = arith.addf %337, %339 : vector<1x3xf32>
      %341 = vector.shape_cast %332 : vector<8x1xi1> to vector<8x1xi1>
      %342 = vector.broadcast %341 : vector<8x1xi1> to vector<8x3xi1>
      %343 = vector.shape_cast %340 : vector<1x3xf32> to vector<1x3xf32>
      %344 = vector.broadcast %343 : vector<1x3xf32> to vector<8x3xf32>
      %345 = arith.select %342, %344, %arg9 : vector<8x3xi1>, vector<8x3xf32>
      scf.yield %309, %324, %327, %330, %345 : vector<1x64xf32>, vector<1x1xf32>, vector<1x1xf32>, vector<1x1xf32>, vector<8x3xf32>
    }
    %c7_i32_10 = arith.constant 7 : i32
    %52 = arith.mulf %2, %2 : vector<1x64xf32>
    %53 = arith.mulf %3, %3 : vector<1x64xf32>
    %54 = arith.addf %52, %53 : vector<1x64xf32>
    %55 = arith.mulf %4, %4 : vector<1x64xf32>
    %56 = arith.addf %54, %55 : vector<1x64xf32>
    %cst_11 = arith.constant dense<0.000000e+00> : vector<8x64xf32>
    %57 = tpu.matmul %51#4, %1, %cst_11 {dimension_numbers = #tpu.dot_dimension_numbers<[1], [0], [0], [1], [0, 0, 1, 1], [], []>} : vector<8x3xf32>, vector<3x64xf32>, vector<8x64xf32> -> vector<8x64xf32>
    %cst_12 = arith.constant 2.000000e+00 : f32
    %58 = vector.broadcast %cst_12 : f32 to vector<8x64xf32>
    %59 = arith.mulf %58, %57 : vector<8x64xf32>
    %60 = vector.broadcast %56 : vector<1x64xf32> to vector<8x64xf32>
    %61 = arith.subf %60, %59 : vector<8x64xf32>
    %cst_13 = arith.constant 0.000000e+00 : f32
    %62 = vector.broadcast %cst_13 : f32 to vector<8x64xf32>
    %c0_i32_14 = arith.constant 0 : i32
    %cst_15 = arith.constant dense<0x7F800000> : vector<8xf32>
    %63 = vector.multi_reduction <minimumf>, %61, %cst_15 [1] : vector<8x64xf32> to vector<8xf32>
    %64 = vector.shape_cast %63 : vector<8xf32> to vector<8x1xf32>
    %65 = tpu.iota {dimensions = array<i32: 1>} : vector<8x64xi32>
    %66 = vector.broadcast %64 : vector<8x1xf32> to vector<8x64xf32>
    %67 = arith.cmpf oeq, %61, %66 : vector<8x64xf32>
    %c64_i32 = arith.constant 64 : i32
    %68 = vector.broadcast %c64_i32 : i32 to vector<8x64xi32>
    %69 = arith.select %67, %65, %68 : vector<8x64xi1>, vector<8x64xi32>
    %cst_16 = arith.constant dense<2147483647> : vector<8xi32>
    %70 = vector.multi_reduction <minsi>, %69, %cst_16 [1] : vector<8x64xi32> to vector<8xi32>
    %71 = vector.shape_cast %70 : vector<8xi32> to vector<8x1xi32>
    %72 = vector.broadcast %71 : vector<8x1xi32> to vector<8x64xi32>
    %73 = arith.cmpi eq, %65, %72 : vector<8x64xi32>
    %74 = arith.extui %73 : vector<8x64xi1> to vector<8x64xi32>
    %75 = arith.sitofp %74 : vector<8x64xi32> to vector<8x64xf32>
    %76 = arith.addf %62, %75 : vector<8x64xf32>
    %cst_17 = arith.constant 0.000000e+00 : f32
    %77 = vector.broadcast %cst_17 : f32 to vector<8x64xf32>
    %78 = arith.cmpf ogt, %75, %77 : vector<8x64xf32>
    %cst_18 = arith.constant 1.000000e+30 : f32
    %79 = vector.broadcast %cst_18 : f32 to vector<8x64xf32>
    %80 = arith.select %78, %79, %61 : vector<8x64xi1>, vector<8x64xf32>
    %c1_i32_19 = arith.constant 1 : i32
    %cst_20 = arith.constant dense<0x7F800000> : vector<8xf32>
    %81 = vector.multi_reduction <minimumf>, %80, %cst_20 [1] : vector<8x64xf32> to vector<8xf32>
    %82 = vector.shape_cast %81 : vector<8xf32> to vector<8x1xf32>
    %83 = tpu.iota {dimensions = array<i32: 1>} : vector<8x64xi32>
    %84 = vector.broadcast %82 : vector<8x1xf32> to vector<8x64xf32>
    %85 = arith.cmpf oeq, %80, %84 : vector<8x64xf32>
    %c64_i32_21 = arith.constant 64 : i32
    %86 = vector.broadcast %c64_i32_21 : i32 to vector<8x64xi32>
    %87 = arith.select %85, %83, %86 : vector<8x64xi1>, vector<8x64xi32>
    %cst_22 = arith.constant dense<2147483647> : vector<8xi32>
    %88 = vector.multi_reduction <minsi>, %87, %cst_22 [1] : vector<8x64xi32> to vector<8xi32>
    %89 = vector.shape_cast %88 : vector<8xi32> to vector<8x1xi32>
    %90 = vector.broadcast %89 : vector<8x1xi32> to vector<8x64xi32>
    %91 = arith.cmpi eq, %83, %90 : vector<8x64xi32>
    %92 = arith.extui %91 : vector<8x64xi1> to vector<8x64xi32>
    %93 = arith.sitofp %92 : vector<8x64xi32> to vector<8x64xf32>
    %94 = arith.addf %76, %93 : vector<8x64xf32>
    %cst_23 = arith.constant 0.000000e+00 : f32
    %95 = vector.broadcast %cst_23 : f32 to vector<8x64xf32>
    %96 = arith.cmpf ogt, %93, %95 : vector<8x64xf32>
    %cst_24 = arith.constant 1.000000e+30 : f32
    %97 = vector.broadcast %cst_24 : f32 to vector<8x64xf32>
    %98 = arith.select %96, %97, %80 : vector<8x64xi1>, vector<8x64xf32>
    %c2_i32_25 = arith.constant 2 : i32
    %cst_26 = arith.constant dense<0x7F800000> : vector<8xf32>
    %99 = vector.multi_reduction <minimumf>, %98, %cst_26 [1] : vector<8x64xf32> to vector<8xf32>
    %100 = vector.shape_cast %99 : vector<8xf32> to vector<8x1xf32>
    %101 = tpu.iota {dimensions = array<i32: 1>} : vector<8x64xi32>
    %102 = vector.broadcast %100 : vector<8x1xf32> to vector<8x64xf32>
    %103 = arith.cmpf oeq, %98, %102 : vector<8x64xf32>
    %c64_i32_27 = arith.constant 64 : i32
    %104 = vector.broadcast %c64_i32_27 : i32 to vector<8x64xi32>
    %105 = arith.select %103, %101, %104 : vector<8x64xi1>, vector<8x64xi32>
    %cst_28 = arith.constant dense<2147483647> : vector<8xi32>
    %106 = vector.multi_reduction <minsi>, %105, %cst_28 [1] : vector<8x64xi32> to vector<8xi32>
    %107 = vector.shape_cast %106 : vector<8xi32> to vector<8x1xi32>
    %108 = vector.broadcast %107 : vector<8x1xi32> to vector<8x64xi32>
    %109 = arith.cmpi eq, %101, %108 : vector<8x64xi32>
    %110 = arith.extui %109 : vector<8x64xi1> to vector<8x64xi32>
    %111 = arith.sitofp %110 : vector<8x64xi32> to vector<8x64xf32>
    %112 = arith.addf %94, %111 : vector<8x64xf32>
    %cst_29 = arith.constant 0.000000e+00 : f32
    %113 = vector.broadcast %cst_29 : f32 to vector<8x64xf32>
    %114 = arith.cmpf ogt, %111, %113 : vector<8x64xf32>
    %cst_30 = arith.constant 1.000000e+30 : f32
    %115 = vector.broadcast %cst_30 : f32 to vector<8x64xf32>
    %116 = arith.select %114, %115, %98 : vector<8x64xi1>, vector<8x64xf32>
    %c3_i32 = arith.constant 3 : i32
    %cst_31 = arith.constant dense<0x7F800000> : vector<8xf32>
    %117 = vector.multi_reduction <minimumf>, %116, %cst_31 [1] : vector<8x64xf32> to vector<8xf32>
    %118 = vector.shape_cast %117 : vector<8xf32> to vector<8x1xf32>
    %119 = tpu.iota {dimensions = array<i32: 1>} : vector<8x64xi32>
    %120 = vector.broadcast %118 : vector<8x1xf32> to vector<8x64xf32>
    %121 = arith.cmpf oeq, %116, %120 : vector<8x64xf32>
    %c64_i32_32 = arith.constant 64 : i32
    %122 = vector.broadcast %c64_i32_32 : i32 to vector<8x64xi32>
    %123 = arith.select %121, %119, %122 : vector<8x64xi1>, vector<8x64xi32>
    %cst_33 = arith.constant dense<2147483647> : vector<8xi32>
    %124 = vector.multi_reduction <minsi>, %123, %cst_33 [1] : vector<8x64xi32> to vector<8xi32>
    %125 = vector.shape_cast %124 : vector<8xi32> to vector<8x1xi32>
    %126 = vector.broadcast %125 : vector<8x1xi32> to vector<8x64xi32>
    %127 = arith.cmpi eq, %119, %126 : vector<8x64xi32>
    %128 = arith.extui %127 : vector<8x64xi1> to vector<8x64xi32>
    %129 = arith.sitofp %128 : vector<8x64xi32> to vector<8x64xf32>
    %130 = arith.addf %112, %129 : vector<8x64xf32>
    %cst_34 = arith.constant 0.000000e+00 : f32
    %131 = vector.broadcast %cst_34 : f32 to vector<8x64xf32>
    %132 = arith.cmpf ogt, %129, %131 : vector<8x64xf32>
    %cst_35 = arith.constant 1.000000e+30 : f32
    %133 = vector.broadcast %cst_35 : f32 to vector<8x64xf32>
    %134 = arith.select %132, %133, %116 : vector<8x64xi1>, vector<8x64xf32>
    %c4_i32 = arith.constant 4 : i32
    %cst_36 = arith.constant dense<0x7F800000> : vector<8xf32>
    %135 = vector.multi_reduction <minimumf>, %134, %cst_36 [1] : vector<8x64xf32> to vector<8xf32>
    %136 = vector.shape_cast %135 : vector<8xf32> to vector<8x1xf32>
    %137 = tpu.iota {dimensions = array<i32: 1>} : vector<8x64xi32>
    %138 = vector.broadcast %136 : vector<8x1xf32> to vector<8x64xf32>
    %139 = arith.cmpf oeq, %134, %138 : vector<8x64xf32>
    %c64_i32_37 = arith.constant 64 : i32
    %140 = vector.broadcast %c64_i32_37 : i32 to vector<8x64xi32>
    %141 = arith.select %139, %137, %140 : vector<8x64xi1>, vector<8x64xi32>
    %cst_38 = arith.constant dense<2147483647> : vector<8xi32>
    %142 = vector.multi_reduction <minsi>, %141, %cst_38 [1] : vector<8x64xi32> to vector<8xi32>
    %143 = vector.shape_cast %142 : vector<8xi32> to vector<8x1xi32>
    %144 = vector.broadcast %143 : vector<8x1xi32> to vector<8x64xi32>
    %145 = arith.cmpi eq, %137, %144 : vector<8x64xi32>
    %146 = arith.extui %145 : vector<8x64xi1> to vector<8x64xi32>
    %147 = arith.sitofp %146 : vector<8x64xi32> to vector<8x64xf32>
    %148 = arith.addf %130, %147 : vector<8x64xf32>
    %cst_39 = arith.constant 0.000000e+00 : f32
    %149 = vector.broadcast %cst_39 : f32 to vector<8x64xf32>
    %150 = arith.cmpf ogt, %147, %149 : vector<8x64xf32>
    %cst_40 = arith.constant 1.000000e+30 : f32
    %151 = vector.broadcast %cst_40 : f32 to vector<8x64xf32>
    %152 = arith.select %150, %151, %134 : vector<8x64xi1>, vector<8x64xf32>
    %c5_i32 = arith.constant 5 : i32
    %cst_41 = arith.constant dense<0x7F800000> : vector<8xf32>
    %153 = vector.multi_reduction <minimumf>, %152, %cst_41 [1] : vector<8x64xf32> to vector<8xf32>
    %154 = vector.shape_cast %153 : vector<8xf32> to vector<8x1xf32>
    %155 = tpu.iota {dimensions = array<i32: 1>} : vector<8x64xi32>
    %156 = vector.broadcast %154 : vector<8x1xf32> to vector<8x64xf32>
    %157 = arith.cmpf oeq, %152, %156 : vector<8x64xf32>
    %c64_i32_42 = arith.constant 64 : i32
    %158 = vector.broadcast %c64_i32_42 : i32 to vector<8x64xi32>
    %159 = arith.select %157, %155, %158 : vector<8x64xi1>, vector<8x64xi32>
    %cst_43 = arith.constant dense<2147483647> : vector<8xi32>
    %160 = vector.multi_reduction <minsi>, %159, %cst_43 [1] : vector<8x64xi32> to vector<8xi32>
    %161 = vector.shape_cast %160 : vector<8xi32> to vector<8x1xi32>
    %162 = vector.broadcast %161 : vector<8x1xi32> to vector<8x64xi32>
    %163 = arith.cmpi eq, %155, %162 : vector<8x64xi32>
    %164 = arith.extui %163 : vector<8x64xi1> to vector<8x64xi32>
    %165 = arith.sitofp %164 : vector<8x64xi32> to vector<8x64xf32>
    %166 = arith.addf %148, %165 : vector<8x64xf32>
    %cst_44 = arith.constant 0.000000e+00 : f32
    %167 = vector.broadcast %cst_44 : f32 to vector<8x64xf32>
    %168 = arith.cmpf ogt, %165, %167 : vector<8x64xf32>
    %cst_45 = arith.constant 1.000000e+30 : f32
    %169 = vector.broadcast %cst_45 : f32 to vector<8x64xf32>
    %170 = arith.select %168, %169, %152 : vector<8x64xi1>, vector<8x64xf32>
    %c6_i32 = arith.constant 6 : i32
    %cst_46 = arith.constant dense<0x7F800000> : vector<8xf32>
    %171 = vector.multi_reduction <minimumf>, %170, %cst_46 [1] : vector<8x64xf32> to vector<8xf32>
    %172 = vector.shape_cast %171 : vector<8xf32> to vector<8x1xf32>
    %173 = tpu.iota {dimensions = array<i32: 1>} : vector<8x64xi32>
    %174 = vector.broadcast %172 : vector<8x1xf32> to vector<8x64xf32>
    %175 = arith.cmpf oeq, %170, %174 : vector<8x64xf32>
    %c64_i32_47 = arith.constant 64 : i32
    %176 = vector.broadcast %c64_i32_47 : i32 to vector<8x64xi32>
    %177 = arith.select %175, %173, %176 : vector<8x64xi1>, vector<8x64xi32>
    %cst_48 = arith.constant dense<2147483647> : vector<8xi32>
    %178 = vector.multi_reduction <minsi>, %177, %cst_48 [1] : vector<8x64xi32> to vector<8xi32>
    %179 = vector.shape_cast %178 : vector<8xi32> to vector<8x1xi32>
    %180 = vector.broadcast %179 : vector<8x1xi32> to vector<8x64xi32>
    %181 = arith.cmpi eq, %173, %180 : vector<8x64xi32>
    %182 = arith.extui %181 : vector<8x64xi1> to vector<8x64xi32>
    %183 = arith.sitofp %182 : vector<8x64xi32> to vector<8x64xf32>
    %184 = arith.addf %166, %183 : vector<8x64xf32>
    %cst_49 = arith.constant 0.000000e+00 : f32
    %185 = vector.broadcast %cst_49 : f32 to vector<8x64xf32>
    %186 = arith.cmpf ogt, %183, %185 : vector<8x64xf32>
    %cst_50 = arith.constant 1.000000e+30 : f32
    %187 = vector.broadcast %cst_50 : f32 to vector<8x64xf32>
    %188 = arith.select %186, %187, %170 : vector<8x64xi1>, vector<8x64xf32>
    %c7_i32_51 = arith.constant 7 : i32
    %cst_52 = arith.constant dense<0x7F800000> : vector<8xf32>
    %189 = vector.multi_reduction <minimumf>, %188, %cst_52 [1] : vector<8x64xf32> to vector<8xf32>
    %190 = vector.shape_cast %189 : vector<8xf32> to vector<8x1xf32>
    %191 = tpu.iota {dimensions = array<i32: 1>} : vector<8x64xi32>
    %192 = vector.broadcast %190 : vector<8x1xf32> to vector<8x64xf32>
    %193 = arith.cmpf oeq, %188, %192 : vector<8x64xf32>
    %c64_i32_53 = arith.constant 64 : i32
    %194 = vector.broadcast %c64_i32_53 : i32 to vector<8x64xi32>
    %195 = arith.select %193, %191, %194 : vector<8x64xi1>, vector<8x64xi32>
    %cst_54 = arith.constant dense<2147483647> : vector<8xi32>
    %196 = vector.multi_reduction <minsi>, %195, %cst_54 [1] : vector<8x64xi32> to vector<8xi32>
    %197 = vector.shape_cast %196 : vector<8xi32> to vector<8x1xi32>
    %198 = vector.broadcast %197 : vector<8x1xi32> to vector<8x64xi32>
    %199 = arith.cmpi eq, %191, %198 : vector<8x64xi32>
    %200 = arith.extui %199 : vector<8x64xi1> to vector<8x64xi32>
    %201 = arith.sitofp %200 : vector<8x64xi32> to vector<8x64xf32>
    %202 = arith.addf %184, %201 : vector<8x64xf32>
    %cst_55 = arith.constant 0.000000e+00 : f32
    %203 = vector.broadcast %cst_55 : f32 to vector<8x64xf32>
    %204 = arith.cmpf ogt, %201, %203 : vector<8x64xf32>
    %cst_56 = arith.constant 1.000000e+30 : f32
    %205 = vector.broadcast %cst_56 : f32 to vector<8x64xf32>
    %206 = arith.select %204, %205, %188 : vector<8x64xi1>, vector<8x64xf32>
    %207 = arith.mulf %2, %2 : vector<1x64xf32>
    %208 = arith.mulf %2, %3 : vector<1x64xf32>
    %209 = arith.mulf %2, %4 : vector<1x64xf32>
    %210 = arith.mulf %3, %3 : vector<1x64xf32>
    %211 = arith.mulf %3, %4 : vector<1x64xf32>
    %212 = arith.mulf %4, %4 : vector<1x64xf32>
    %213 = tpu.concatenate %2, %3, %4, %207, %208, %209, %210, %211, %212 in 0 : vector<1x64xf32>, vector<1x64xf32>, vector<1x64xf32>, vector<1x64xf32>, vector<1x64xf32>, vector<1x64xf32>, vector<1x64xf32>, vector<1x64xf32>, vector<1x64xf32> -> vector<9x64xf32>
    %cst_57 = arith.constant dense<0.000000e+00> : vector<9x8xf32>
    %214 = tpu.matmul %213, %202, %cst_57 {dimension_numbers = #tpu.dot_dimension_numbers<[1], [1], [0], [0], [0, 0, 1, 0], [], []>} : vector<9x64xf32>, vector<8x64xf32>, vector<9x8xf32> -> vector<9x8xf32>
    %215 = vector.extract_strided_slice %214 {offsets = [0, 0], sizes = [1, 8], strides = [1, 1]} : vector<9x8xf32> to vector<1x8xf32>
    %cst_58 = arith.constant 8.000000e+00 : f32
    %216 = vector.broadcast %cst_58 : f32 to vector<1x8xf32>
    %217 = arith.divf %215, %216 : vector<1x8xf32>
    %218 = vector.extract_strided_slice %214 {offsets = [1, 0], sizes = [1, 8], strides = [1, 1]} : vector<9x8xf32> to vector<1x8xf32>
    %cst_59 = arith.constant 8.000000e+00 : f32
    %219 = vector.broadcast %cst_59 : f32 to vector<1x8xf32>
    %220 = arith.divf %218, %219 : vector<1x8xf32>
    %221 = vector.extract_strided_slice %214 {offsets = [2, 0], sizes = [1, 8], strides = [1, 1]} : vector<9x8xf32> to vector<1x8xf32>
    %cst_60 = arith.constant 8.000000e+00 : f32
    %222 = vector.broadcast %cst_60 : f32 to vector<1x8xf32>
    %223 = arith.divf %221, %222 : vector<1x8xf32>
    %224 = vector.extract_strided_slice %214 {offsets = [3, 0], sizes = [1, 8], strides = [1, 1]} : vector<9x8xf32> to vector<1x8xf32>
    %cst_61 = arith.constant 8.000000e+00 : f32
    %225 = vector.broadcast %cst_61 : f32 to vector<1x8xf32>
    %226 = arith.mulf %225, %217 : vector<1x8xf32>
    %227 = arith.mulf %226, %217 : vector<1x8xf32>
    %228 = arith.subf %224, %227 : vector<1x8xf32>
    %229 = vector.extract_strided_slice %214 {offsets = [4, 0], sizes = [1, 8], strides = [1, 1]} : vector<9x8xf32> to vector<1x8xf32>
    %cst_62 = arith.constant 8.000000e+00 : f32
    %230 = vector.broadcast %cst_62 : f32 to vector<1x8xf32>
    %231 = arith.mulf %230, %217 : vector<1x8xf32>
    %232 = arith.mulf %231, %220 : vector<1x8xf32>
    %233 = arith.subf %229, %232 : vector<1x8xf32>
    %234 = vector.extract_strided_slice %214 {offsets = [5, 0], sizes = [1, 8], strides = [1, 1]} : vector<9x8xf32> to vector<1x8xf32>
    %cst_63 = arith.constant 8.000000e+00 : f32
    %235 = vector.broadcast %cst_63 : f32 to vector<1x8xf32>
    %236 = arith.mulf %235, %217 : vector<1x8xf32>
    %237 = arith.mulf %236, %223 : vector<1x8xf32>
    %238 = arith.subf %234, %237 : vector<1x8xf32>
    %239 = vector.extract_strided_slice %214 {offsets = [6, 0], sizes = [1, 8], strides = [1, 1]} : vector<9x8xf32> to vector<1x8xf32>
    %cst_64 = arith.constant 8.000000e+00 : f32
    %240 = vector.broadcast %cst_64 : f32 to vector<1x8xf32>
    %241 = arith.mulf %240, %220 : vector<1x8xf32>
    %242 = arith.mulf %241, %220 : vector<1x8xf32>
    %243 = arith.subf %239, %242 : vector<1x8xf32>
    %244 = vector.extract_strided_slice %214 {offsets = [7, 0], sizes = [1, 8], strides = [1, 1]} : vector<9x8xf32> to vector<1x8xf32>
    %cst_65 = arith.constant 8.000000e+00 : f32
    %245 = vector.broadcast %cst_65 : f32 to vector<1x8xf32>
    %246 = arith.mulf %245, %220 : vector<1x8xf32>
    %247 = arith.mulf %246, %223 : vector<1x8xf32>
    %248 = arith.subf %244, %247 : vector<1x8xf32>
    %249 = vector.extract_strided_slice %214 {offsets = [8, 0], sizes = [1, 8], strides = [1, 1]} : vector<9x8xf32> to vector<1x8xf32>
    %cst_66 = arith.constant 8.000000e+00 : f32
    %250 = vector.broadcast %cst_66 : f32 to vector<1x8xf32>
    %251 = arith.mulf %250, %223 : vector<1x8xf32>
    %252 = arith.mulf %251, %223 : vector<1x8xf32>
    %253 = arith.subf %249, %252 : vector<1x8xf32>
    %cst_67 = arith.constant 6.000000e-01 : f32
    %254 = vector.broadcast %cst_67 : f32 to vector<1x8xf32>
    %cst_68 = arith.constant 5.000000e-01 : f32
    %255 = vector.broadcast %cst_68 : f32 to vector<1x8xf32>
    %cst_69 = arith.constant 4.000000e-01 : f32
    %256 = vector.broadcast %cst_69 : f32 to vector<1x8xf32>
    %c0_i32_70 = arith.constant 0 : i32
    %c32_i32 = arith.constant 32 : i32
    %257 = arith.addi %c0_i32_70, %c32_i32 : i32
    %c1_i32_71 = arith.constant 1 : i32
    %258:3 = scf.for %arg4 = %c0_i32_70 to %257 step %c1_i32_71 iter_args(%arg5 = %254, %arg6 = %255, %arg7 = %256) -> (vector<1x8xf32>, vector<1x8xf32>, vector<1x8xf32>)  : i32 {
      %298 = arith.mulf %228, %arg5 : vector<1x8xf32>
      %299 = arith.mulf %233, %arg6 : vector<1x8xf32>
      %300 = arith.addf %298, %299 : vector<1x8xf32>
      %301 = arith.mulf %238, %arg7 : vector<1x8xf32>
      %302 = arith.addf %300, %301 : vector<1x8xf32>
      %303 = arith.mulf %233, %arg5 : vector<1x8xf32>
      %304 = arith.mulf %243, %arg6 : vector<1x8xf32>
      %305 = arith.addf %303, %304 : vector<1x8xf32>
      %306 = arith.mulf %248, %arg7 : vector<1x8xf32>
      %307 = arith.addf %305, %306 : vector<1x8xf32>
      %308 = arith.mulf %238, %arg5 : vector<1x8xf32>
      %309 = arith.mulf %248, %arg6 : vector<1x8xf32>
      %310 = arith.addf %308, %309 : vector<1x8xf32>
      %311 = arith.mulf %253, %arg7 : vector<1x8xf32>
      %312 = arith.addf %310, %311 : vector<1x8xf32>
      %313 = arith.mulf %302, %302 : vector<1x8xf32>
      %314 = arith.mulf %307, %307 : vector<1x8xf32>
      %315 = arith.addf %313, %314 : vector<1x8xf32>
      %316 = arith.mulf %312, %312 : vector<1x8xf32>
      %317 = arith.addf %315, %316 : vector<1x8xf32>
      %cst_83 = arith.constant 1.000000e-30 : f32
      %318 = vector.broadcast %cst_83 : f32 to vector<1x8xf32>
      %319 = arith.addf %317, %318 : vector<1x8xf32>
      %320 = math.rsqrt %319 : vector<1x8xf32>
      %321 = arith.mulf %302, %320 : vector<1x8xf32>
      %322 = arith.mulf %307, %320 : vector<1x8xf32>
      %323 = arith.mulf %312, %320 : vector<1x8xf32>
      scf.yield %321, %322, %323 : vector<1x8xf32>, vector<1x8xf32>, vector<1x8xf32>
    }
    %c0_72 = arith.constant 0 : index
    %c0_73 = arith.constant 0 : index
    %c0_74 = arith.constant 0 : index
    %259 = vector.load %arg2[%c0_72, %c0_73, %c0_74] : memref<1x3x8xf32, #tpu.memory_space<vmem>>, vector<1x3x8xf32>
    %260 = vector.shape_cast %259 : vector<1x3x8xf32> to vector<3x8xf32>
    %261 = vector.extract_strided_slice %260 {offsets = [0, 0], sizes = [1, 8], strides = [1, 1]} : vector<3x8xf32> to vector<1x8xf32>
    %262 = vector.extract_strided_slice %260 {offsets = [1, 0], sizes = [1, 8], strides = [1, 1]} : vector<3x8xf32> to vector<1x8xf32>
    %263 = vector.extract_strided_slice %260 {offsets = [2, 0], sizes = [1, 8], strides = [1, 1]} : vector<3x8xf32> to vector<1x8xf32>
    %264 = arith.mulf %261, %258#0 : vector<1x8xf32>
    %265 = arith.mulf %262, %258#1 : vector<1x8xf32>
    %266 = arith.addf %264, %265 : vector<1x8xf32>
    %267 = arith.mulf %263, %258#2 : vector<1x8xf32>
    %268 = arith.addf %266, %267 : vector<1x8xf32>
    %269 = arith.mulf %261, %261 : vector<1x8xf32>
    %270 = arith.mulf %262, %262 : vector<1x8xf32>
    %271 = arith.addf %269, %270 : vector<1x8xf32>
    %272 = arith.mulf %263, %263 : vector<1x8xf32>
    %273 = arith.addf %271, %272 : vector<1x8xf32>
    %274 = math.sqrt %273 : vector<1x8xf32>
    %275 = arith.mulf %258#0, %258#0 : vector<1x8xf32>
    %276 = arith.mulf %258#1, %258#1 : vector<1x8xf32>
    %277 = arith.addf %275, %276 : vector<1x8xf32>
    %278 = arith.mulf %258#2, %258#2 : vector<1x8xf32>
    %279 = arith.addf %277, %278 : vector<1x8xf32>
    %280 = math.sqrt %279 : vector<1x8xf32>
    %281 = arith.mulf %274, %280 : vector<1x8xf32>
    %cst_75 = arith.constant 9.99999993E-9 : f32
    %282 = vector.broadcast %cst_75 : f32 to vector<1x8xf32>
    %283 = arith.maximumf %281, %282 : vector<1x8xf32>
    %284 = arith.divf %268, %283 : vector<1x8xf32>
    %285 = math.absf %284 : vector<1x8xf32>
    %cst_76 = arith.constant 9.99999997E-7 : f32
    %286 = vector.broadcast %cst_76 : f32 to vector<1x8xf32>
    %287 = arith.addf %285, %286 : vector<1x8xf32>
    %288 = math.log %287 : vector<1x8xf32>
    %cst_77 = arith.constant dense<0.000000e+00> : vector<1xf32>
    %289 = vector.multi_reduction <add>, %288, %cst_77 [1] : vector<1x8xf32> to vector<1xf32>
    %290 = vector.shape_cast %289 : vector<1xf32> to vector<1x1xf32>
    %cst_78 = arith.constant 0.000000e+00 : f32
    %291 = vector.broadcast %cst_78 : f32 to vector<1x1xf32>
    %292 = arith.subf %291, %290 : vector<1x1xf32>
    %cst_79 = arith.constant 1.250000e-01 : f32
    %293 = vector.broadcast %cst_79 : f32 to vector<1x1xf32>
    %294 = arith.mulf %292, %293 : vector<1x1xf32>
    %c0_80 = arith.constant 0 : index
    %c0_81 = arith.constant 0 : index
    %c0_82 = arith.constant 0 : index
    %295 = vector.load %arg3[%c0_80, %c0_81, %c0_82] : memref<1x1x1xf32, #tpu.memory_space<vmem>>, vector<1x1x1xf32>
    %296 = vector.shape_cast %295 : vector<1x1x1xf32> to vector<1x1xf32>
    %297 = vector.shape_cast %294 : vector<1x1xf32> to vector<1x1x1xf32>
    tpu.vector_store %arg3[%c0_80, %c0_81, %c0_82], %297 {strides = array<i32>} : memref<1x1x1xf32, #tpu.memory_space<vmem>>, vector<1x1x1xf32>,
    return
  }
  func.func @transform_0(%arg0: i32) -> (i32, i32, i32) {
    %c0_i32 = arith.constant 0 : i32
    %c0_i32_0 = arith.constant 0 : i32
    %c0_i32_1 = arith.constant 0 : i32
    return %arg0, %c0_i32, %c0_i32_0 : i32, i32, i32
  }
  func.func @transform_1(%arg0: i32) -> (i32, i32, i32) {
    %c0_i32 = arith.constant 0 : i32
    %c0_i32_0 = arith.constant 0 : i32
    %c0_i32_1 = arith.constant 0 : i32
    return %arg0, %c0_i32, %c0_i32_0 : i32, i32, i32
  }
  func.func @transform_2(%arg0: i32) -> (i32, i32, i32) {
    %c0_i32 = arith.constant 0 : i32
    %c0_i32_0 = arith.constant 0 : i32
    %c0_i32_1 = arith.constant 0 : i32
    return %arg0, %c0_i32, %c0_i32_0 : i32, i32, i32
  }
}

</mosaic_0001>

<bundles_post_ra>
// kernel: tpu_custom_call.1
= control target key start
LH: loop header
LB: loop body
LE: loop exit
PB: predicated region body
PF: predicated region fallthrough
CT: control target
= control target key end

     0   :  { %s1234_s9 = smov 0   ;;  %s1439_s0 = inlined_call_operand.vmem [shape: f32[2,3,64], index: 0, kind: input, shape index: {}]   ;;  %s1440_s1 = inlined_call_operand.vmem [shape: f32[2,3,8], index: 1, kind: input, shape index: {}]   ;;  %s1441_s2 = inlined_call_operand.vmem [shape: f32[2,1,1], index: 2, kind: output, shape index: {}]  }
   0x1 LB: > { %s983_s10 = sadd.s32 4294967295, %s1173_s9   ;;  %p987_p0 = scmp.ge.s32.totalorder %s1173_s9, 1  ;;  %s1173_s9 = sphi %s1234_s9, %s12_s9  }
   0x2   : > { %p120_p1 = scmp.lt.s32.totalorder %s1173_s9, 3 }
   0x4   : > { %p121_p2 = pnand %p987_p0, %p120_p1 }
   0x5   : > { %p143_p3 = scmp.lt.s32.totalorder (!%p121_p2), %s983_s10, 1  ;;  %v155_v0 = vlaneseq (!%p121_p2)  ;;  %v1215_v2 = vmov (!%p121_p2), 0.0   ;;  %vm173_vm2 = vcmask (!%p121_p2), 517121   ;;  %vm177_vm3 = vcmask (!%p121_p2), 518146   ;;  %s1296_s21 = smov (!%p121_p2), 1  }
   0x6   : > { %124 = sbr.rel (%p121_p2) target bundleno = 5161 (0x1429), region = 28  ;;  %vm169_vm4 = vcmask (!%p121_p2), 516096   ;;  %v1294_v27 = vmov (!%p121_p2), 1e+30  }
   0x7   : > { %v1244_v1 = vand.u32 (!%p121_p2), 127, %v155_v0  ;;  %v1278_v17 = vshrl.u32 (!%p121_p2), %v155_v0, 7 }
   0x9   : > { %vm159_vm0 = vcmp.eq.s32.totalorder (!%p121_p2), %v1244_v1, 0  ;;  %vm162_vm1 = vcmp.eq.s32.totalorder (!%p121_p2), %v1244_v1, 1  ;;  %vm165_vm5 = vcmp.eq.s32.totalorder (!%p121_p2), %v1244_v1, 2  ;;  %v1282_v22 = vsub.s32 (!%p121_p2), 0, %v1278_v17 }
   0xa   : > { %v1262_v3 = vsel (!%p121_p2), %vm159_vm0, 1.0, %v1215_v2  ;;  %v1265_v4 = vsel (!%p121_p2), %vm162_vm1, 1.0, %v1215_v2  ;;  %v1274_v10 = vsel (!%p121_p2), %vm165_vm5, 1.0, %v1215_v2  ;;  %vm181_vm6 = vcmp.eq.s32.totalorder (!%p121_p2), %v1278_v17, 0 }
   0xd   : > { %s1444_s10 = smov (!%p143_p3, %s983_s10), 1 }
   0xe   : > { %s988_s11 = sshll.u32 %s1444_s10, 2  ;;  %s153_s14 = scalar_lea.vmem %s1441_s2, %s1444_s10 }
   0xf   : > { %s146_s17 = scalar_lea.vmem %s1439_s0, %s988_s11  ;;  %s1259_s20 = scalar_lea.vmem %s1440_s1, %s988_s11 }
  0x10   : > { %v1267_v5 = vld [vmem:[%s146_s17] sm:$0x7] }
  0x11   : > { %v168_v6 = vmul.f32 %v1262_v3, %v1267_v5 }
  0x13   : > { %v174_v7 = vsel %vm173_vm2, %v168_v6, 0.0  ;;  %v178_v8 = vsel %vm177_vm3, %v168_v6, 0.0  ;;  %v170_v9 = vsel %vm169_vm4, %v168_v6, 0.0 }
  0x14   : > { %175 = vadd.xlane.f32.xlu0 %v174_v7  ;;  %179 = vadd.xlane.f32.xlu1 %v178_v8 }
  0x18   : > { %171 = vadd.xlane.f32.xlu0 %v170_v9 }
  0xa1   : > { %v176_v11 = vpop.xlane.xlu0 %175  ;;  %v180_v12 = vpop.xlane.xlu1 %179 }
  0xa2   : > { %v183_v13 = vmul.f32 %v1265_v4, %v176_v11  ;;  %v201_v14 = vrot.slane %v176_v11, 1   ;;  %v188_v15 = vmul.f32 %v1274_v10, %v180_v12  ;;  %v204_v16 = vrot.slane %v180_v12, 2  }
  0xa4   : > { %v185_v19 = vrot.slane %v183_v13, 1  ;;  %v190_v20 = vrot.slane %v188_v15, 2 }
  0xa5   : > { %v172_v18 = vpop.xlane.xlu0 %171  }
  0xa6   : > { %v182_v21 = vmul.f32 %v1262_v3, %v172_v18 }
  0xa8   : > { %v187_v23 = vadd.f32 %v185_v19, %v182_v21 }
  0xaa   : > { %v192_v24 = vadd.f32 %v190_v20, %v187_v23 }
  0xac   : > { %v198_v25 = vrot.slane %v192_v24, %v1282_v22 }
  0xae   : > { %v199_v26 = vsel %vm181_vm6, %v198_v25, 0.0  }
  0xaf LB: >> { %v1216_v28 = vmov 0   ;;  %v217_v31 = vsub.f32 %v1267_v5, %v1189_v18  ;;  %v272_v58 = vrot.slane %v1267_v5, 1  ;;  %v1217_v59 = vmov 0.0   ;;  %s1197_s21 = sphi %s1296_s21, %s211_s21   ;;  %v1193_v27 = vphi %v1294_v27, %v243_v27   ;;  %v1189_v18 = vphi %v172_v18, %v270_v18   ;;  %v1185_v14 = vphi %v201_v14, %v277_v14   ;;  %v1181_v16 = vphi %v204_v16, %v283_v16   ;;  %v1177_v26 = vphi %v199_v26, %v1442_v26  }
  0xb0   : >> { %1116 = vset.pattern.permute.xlu0 %v1216_v28  ;;  %v278_v0 = vrot.slane %v1267_v5, 2  ;;  %v284_v13 = vstv %s1197_s21  ;;  %s211_s21 = sadd.s32 1, %s1197_s21  }
  0xb1   : >> { %221 = vperm.xlu0 %1116, %v1185_v14   ;;  %v218_v36 = vmul.f32 %v217_v31, %v217_v31  ;;  %vm285_vm10 = vcmp.eq.s32.totalorder %v1278_v17, %v284_v13  ;;  %p208_p4 = scmp.ge.s32.totalorder %s211_s21, 8  }
  0xb2   : > { %1014 = vmatprep.subr.mxu0 (%p208_p4), %v1215_v2  ;;  %vm310_vm11 = vcmask (%p208_p4), 1042432   ;;  %vm306_vm12 = vcmask (%p208_p4), 23552   ;;  %vm1218_vm13 = vmmov (%p208_p4), 0   ;;  %v1351_v23 = vmul.f32 (%p208_p4), %v1267_v5, %v1267_v5  ;;  %s1419_s22 = smov (%p208_p4), 0  }
  0xb3   : > { %1015 = vmatpush3.msk.msra.mxu0 (%p208_p4), %vm310_vm11, %v1267_v5  ;;  %1016 = vmatprep.mubr.msk.f32.mxu0 (%p208_p4), %vm1218_vm13, %v1215_v2  ;;  %vm390_vm14 = vcmask (%p208_p4), 523264  }
  0xb4   : > { %v300_v24 = vrot.slane (%p208_p4), %v1351_v23, 1 }
  0xb5   : >> { %233 = vperm.xlu0 %1116, %v1181_v16  }
  0xb6   : > { %v302_v25 = vadd.f32 (%p208_p4), %v300_v24, %v1351_v23 }
 0x130   : >> { %v222_v29 = vpop.permute.xlu0 %221 }
 0x131   : >> { %v223_v30 = vrot.slane %v222_v29, 7 }
 0x133   : >> { %v225_v32 = vsub.f32 %v1267_v5, %v223_v30 }
 0x134   : >> { %v234_v33 = vpop.permute.xlu0 %233 }
 0x135   : >> { %v226_v34 = vmul.f32 %v225_v32, %v225_v32  ;;  %v235_v35 = vrot.slane %v234_v33, 6 }
 0x137   : >> { %v228_v37 = vrot.slane %v226_v34, 1  ;;  %v237_v38 = vsub.f32 %v1267_v5, %v235_v35 }
 0x139   : >> { %v238_v39 = vmul.f32 %v237_v38, %v237_v38  ;;  %v230_v40 = vadd.f32 %v228_v37, %v218_v36 }
 0x13b   : >> { %v240_v41 = vrot.slane %v238_v39, 2 }
 0x13d   : >> { %v242_v42 = vadd.f32 %v240_v41, %v230_v40 }
 0x13f   : >> { %v243_v27 = vmin.f32 %v1193_v27, %v242_v42  }
 0x141   : >> { %v244_v43 = vsel %vm169_vm4, %v243_v27, -inf }
 0x142   : >> { %245 = vmax.xlane.f32.xlu1 %v244_v43 }
 0x1cf   : >> { %v246_v44 = vpop.xlane.xlu1 %245 }
 0x1d0   : >> { %vm247_vm7 = vcmp.eq.f32.partialorder %v243_v27, %v246_v44 }
 0x1d1   : >> { %v248_v45 = vsel %vm247_vm7, %v1244_v1, 4294967295 }
 0x1d2   : >> { %v249_v46 = vsel %vm169_vm4, %v248_v45, 2147483648 }
 0x1d3   : >> { %v251_v47 = vshra.s32 %v249_v46, 16  ;;  %v250_v49 = vand.u32 65535, %v249_v46 }
 0x1d5   : >> { %v253_v48 = vcvt.s32.f32 %v251_v47  ;;  %v252_v51 = vcvt.s32.f32 %v250_v49 }
 0x1d7   : >> { %254 = vmax.xlane.f32.xlu1 %v253_v48 }
 0x264   : >> { %v255_v50 = vpop.xlane.xlu1 %254 }
 0x265   : >> { %vm256_vm8 = vcmp.eq.f32.partialorder %v253_v48, %v255_v50  ;;  %v261_v53 = vcvt.f32.s32 %v255_v50 }
 0x266   : >> { %v257_v52 = vsel %vm256_vm8, %v252_v51, -inf }
 0x267   : >> { %258 = vmax.xlane.f32.xlu0 %v257_v52  ;;  %v262_v55 = vshll.u32 %v261_v53, 16 }
 0x2f4   : >> { %v259_v54 = vpop.xlane.xlu0 %258 }
 0x2f5   : >> { %v260_v56 = vcvt.f32.s32 %v259_v54 }
 0x2f7   : >> { %v263_v57 = vadd.s32 %v262_v55, %v260_v56 }
 0x2f9   : >> { %vm264_vm9 = vcmp.eq.s32.totalorder %v1244_v1, %v263_v57 }
 0x2fa   : >> { %v993_v60 = vsel %vm264_vm9, 1.0, %v1217_v59 }
 0x2fb   : >> { %v267_v61 = vmul.f32 %v993_v60, %v1267_v5  ;;  %v274_v63 = vmul.f32 %v993_v60, %v272_v58  ;;  %v280_v7 = vmul.f32 %v993_v60, %v278_v0 }
 0x2fd   : >> { %v268_v62 = vsel %vm169_vm4, %v267_v61, 0.0  ;;  %v275_v6 = vsel %vm169_vm4, %v274_v63, 0.0  ;;  %v281_v8 = vsel %vm169_vm4, %v280_v7, 0.0 }
 0x2fe   : >> { %269 = vadd.xlane.f32.xlu1 %v268_v62 }
 0x302   : >> { %276 = vadd.xlane.f32.xlu1 %v275_v6 }
 0x306   : >> { %282 = vadd.xlane.f32.xlu1 %v281_v8 }
 0x38b   : >> { %v270_v18 = vpop.xlane.xlu1 %269  }
 0x38c   : >> { %v286_v11 = vmul.f32 %v1262_v3, %v270_v18  ;;  %v303_v3 = vrot.slane (%p208_p4), %v1351_v23, 2 }
 0x38f   : >> { %v277_v14 = vpop.xlane.xlu1 %276  }
 0x390   : >> { %v287_v9 = vmul.f32 %v1265_v4, %v277_v14  ;;  %v305_v4 = vadd.f32 (%p208_p4), %v303_v3, %v302_v25 }
 0x392   : >> { %v288_v12 = vadd.f32 %v287_v9, %v286_v11 }
 0x393   : >> { %v283_v16 = vpop.xlane.xlu1 %282  }
 0x394   : >> { %v289_v15 = vmul.f32 %v1274_v10, %v283_v16  ;;  %v388_v10 = vrot.slane (%p208_p4), %v305_v4, %v1282_v22 }
 0x395   : > { %210 = sbr.rel (!%p208_p4) target bundleno = 175 (0xaf), region = 75 }
 0x396   : >> { %v290_v19 = vadd.f32 %v289_v15, %v288_v12 }
 0x398   : >> { %v296_v20 = vrot.slane %v290_v19, %v1282_v22 }
 0x39a   : >> { %v297_v21 = vsel %vm285_vm10, %v296_v20, %v1177_v26  }
 0x39b   : >> { %v1442_v26 = vmov %v297_v21  ;;  %1017 = vmatmul.mubr.msk.f32.vlgmr.msra.gmra.mrb[0].mxu0 (%p208_p4), %vm306_vm12, %v297_v21 }
 0x46e   : > { %v380_v14 = vpop.f32.mrb[0].mxu0 }
 0x46f   : > { %v384_v16 = vmul.f32 2.0, %v380_v14  ;;  %v1018_v17 = vpop.f32.mrb[1].mxu0 }
 0x471   : > { %v389_v18 = vsub.f32 %v388_v10, %v384_v16 }
 0x473   : > { %v391_v26 = vsel %vm390_vm14, %v389_v18, inf }
 0x474   : > { %392 = vmin.xlane.f32.xlu0 %v391_v26 }
 0x501   : > { %v393_v27 = vpop.xlane.xlu0 %392 }
 0x502   : > { %vm394_vm15 = vcmp.eq.f32.partialorder %v389_v18, %v393_v27 }
 0x503   : > { %v395_v28 = vsel %vm394_vm15, %v1244_v1, 64 }
 0x504   : > { %v396_v29 = vsel %vm390_vm14, %v395_v28, 2147483647 }
 0x505   : > { %v398_v30 = vshra.s32 %v396_v29, 16  ;;  %v397_v32 = vand.u32 65535, %v396_v29 }
 0x507   : > { %v400_v31 = vcvt.s32.f32 %v398_v30  ;;  %v399_v22 = vcvt.s32.f32 %v397_v32 }
 0x509   : > { %401 = vmin.xlane.f32.xlu0 %v400_v31 }
 0x596   : > { %v402_v33 = vpop.xlane.xlu0 %401 }
 0x597   : > { %vm403_vm0 = vcmp.eq.f32.partialorder %v400_v31, %v402_v33  ;;  %v408_v35 = vcvt.f32.s32 %v402_v33 }
 0x598   : > { %v404_v34 = vsel %vm403_vm0, %v399_v22, inf }
 0x599   : > { %405 = vmin.xlane.f32.xlu1 %v404_v34  ;;  %v409_v37 = vshll.u32 %v408_v35, 16 }
 0x626   : > { %v406_v36 = vpop.xlane.xlu1 %405 }
 0x627   : > { %v407_v38 = vcvt.f32.s32 %v406_v36 }
 0x629   : > { %v410_v39 = vadd.s32 %v409_v37, %v407_v38 }
 0x62b   : > { %vm411_vm1 = vcmp.eq.s32.totalorder %v1244_v1, %v410_v39 }
 0x62c   : > { %v996_v40 = vsel %vm411_vm1, 1.0, %v1215_v2 }
 0x62d   : > { %vm415_vm2 = vcmp.gt.f32.partialorder %v996_v40, 0.0 }
 0x62e   : > { %v416_v41 = vsel %vm415_vm2, 1e+30, %v389_v18 }
 0x62f   : > { %v417_v42 = vsel %vm390_vm14, %v416_v41, inf }
 0x630   : > { %418 = vmin.xlane.f32.xlu1 %v417_v42 }
 0x6bd   : > { %v419_v43 = vpop.xlane.xlu1 %418 }
 0x6be   : > { %vm420_vm3 = vcmp.eq.f32.partialorder %v416_v41, %v419_v43 }
 0x6bf   : > { %v421_v44 = vsel %vm420_vm3, %v1244_v1, 64 }
 0x6c0   : > { %v422_v45 = vsel %vm390_vm14, %v421_v44, 2147483647 }
 0x6c1   : > { %v424_v46 = vshra.s32 %v422_v45, 16  ;;  %v423_v48 = vand.u32 65535, %v422_v45 }
 0x6c3   : > { %v426_v47 = vcvt.s32.f32 %v424_v46  ;;  %v425_v50 = vcvt.s32.f32 %v423_v48 }
 0x6c5   : > { %427 = vmin.xlane.f32.xlu0 %v426_v47 }
 0x752   : > { %v428_v49 = vpop.xlane.xlu0 %427 }
 0x753   : > { %vm429_vm4 = vcmp.eq.f32.partialorder %v426_v47, %v428_v49  ;;  %v434_v52 = vcvt.f32.s32 %v428_v49 }
 0x754   : > { %v430_v51 = vsel %vm429_vm4, %v425_v50, inf }
 0x755   : > { %431 = vmin.xlane.f32.xlu1 %v430_v51  ;;  %v435_v54 = vshll.u32 %v434_v52, 16 }
 0x7e2   : > { %v432_v53 = vpop.xlane.xlu1 %431 }
 0x7e3   : > { %v433_v55 = vcvt.f32.s32 %v432_v53 }
 0x7e5   : > { %v436_v56 = vadd.s32 %v435_v54, %v433_v55 }
 0x7e7   : > { %vm437_vm5 = vcmp.eq.s32.totalorder %v1244_v1, %v436_v56 }
 0x7e8   : > { %v997_v57 = vsel %vm437_vm5, 1.0, %v1215_v2 }
 0x7e9   : > { %vm441_vm6 = vcmp.gt.f32.partialorder %v997_v57, 0.0  ;;  %v440_v24 = vadd.f32 %v997_v57, %v996_v40 }
 0x7ea   : > { %v442_v59 = vsel %vm441_vm6, 1e+30, %v416_v41 }
 0x7eb   : > { %v443_v60 = vsel %vm390_vm14, %v442_v59, inf }
 0x7ec   : > { %444 = vmin.xlane.f32.xlu0 %v443_v60 }
 0x879   : > { %v445_v61 = vpop.xlane.xlu0 %444 }
 0x87a   : > { %vm446_vm7 = vcmp.eq.f32.partialorder %v442_v59, %v445_v61 }
 0x87b   : > { %v447_v62 = vsel %vm446_vm7, %v1244_v1, 64 }
 0x87c   : > { %v448_v63 = vsel %vm390_vm14, %v447_v62, 2147483647 }
 0x87d   : > { %v450_v6 = vshra.s32 %v448_v63, 16  ;;  %v449_v8 = vand.u32 65535, %v448_v63 }
 0x87f   : > { %v452_v7 = vcvt.s32.f32 %v450_v6  ;;  %v451_v11 = vcvt.s32.f32 %v449_v8 }
 0x881   : > { %453 = vmin.xlane.f32.xlu1 %v452_v7 }
 0x90e   : > { %v454_v9 = vpop.xlane.xlu1 %453 }
 0x90f   : > { %vm455_vm8 = vcmp.eq.f32.partialorder %v452_v7, %v454_v9  ;;  %v460_v13 = vcvt.f32.s32 %v454_v9 }
 0x910   : > { %v456_v12 = vsel %vm455_vm8, %v451_v11, inf }
 0x911   : > { %457 = vmin.xlane.f32.xlu0 %v456_v12  ;;  %v461_v19 = vshll.u32 %v460_v13, 16 }
 0x99e   : > { %v458_v15 = vpop.xlane.xlu0 %457 }
 0x99f   : > { %v459_v20 = vcvt.f32.s32 %v458_v15 }
 0x9a1   : > { %v462_v21 = vadd.s32 %v461_v19, %v459_v20 }
 0x9a3   : > { %vm463_vm9 = vcmp.eq.s32.totalorder %v1244_v1, %v462_v21 }
 0x9a4   : > { %v998_v25 = vsel %vm463_vm9, 1.0, %v1215_v2 }
 0x9a5   : > { %v466_v4 = vadd.f32 %v998_v25, %v440_v24  ;;  %vm467_vm10 = vcmp.gt.f32.partialorder %v998_v25, 0.0 }
 0x9a6   : > { %v468_v10 = vsel %vm467_vm10, 1e+30, %v442_v59 }
 0x9a7   : > { %v469_v14 = vsel %vm390_vm14, %v468_v10, inf }
 0x9a8   : > { %470 = vmin.xlane.f32.xlu1 %v469_v14 }
 0xa35   : > { %v471_v16 = vpop.xlane.xlu1 %470 }
 0xa36   : > { %vm472_vm12 = vcmp.eq.f32.partialorder %v468_v10, %v471_v16 }
 0xa37   : > { %v473_v17 = vsel %vm472_vm12, %v1244_v1, 64 }
 0xa38   : > { %v474_v18 = vsel %vm390_vm14, %v473_v17, 2147483647 }
 0xa39   : > { %v476_v26 = vshra.s32 %v474_v18, 16  ;;  %v475_v28 = vand.u32 65535, %v474_v18 }
 0xa3b   : > { %v478_v27 = vcvt.s32.f32 %v476_v26  ;;  %v477_v30 = vcvt.s32.f32 %v475_v28 }
 0xa3d   : > { %479 = vmin.xlane.f32.xlu0 %v478_v27 }
 0xaca   : > { %v480_v29 = vpop.xlane.xlu0 %479 }
 0xacb   : > { %vm481_vm13 = vcmp.eq.f32.partialorder %v478_v27, %v480_v29  ;;  %v486_v32 = vcvt.f32.s32 %v480_v29 }
 0xacc   : > { %v482_v31 = vsel %vm481_vm13, %v477_v30, inf }
 0xacd   : > { %483 = vmin.xlane.f32.xlu1 %v482_v31  ;;  %v487_v22 = vshll.u32 %v486_v32, 16 }
 0xb5a   : > { %v484_v33 = vpop.xlane.xlu1 %483 }
 0xb5b   : > { %v485_v34 = vcvt.f32.s32 %v484_v33 }
 0xb5d   : > { %v488_v35 = vadd.s32 %v487_v22, %v485_v34 }
 0xb5f   : > { %vm489_vm15 = vcmp.eq.s32.totalorder %v1244_v1, %v488_v35 }
 0xb60   : > { %v999_v36 = vsel %vm489_vm15, 1.0, %v1215_v2 }
 0xb61   : > { %v492_v37 = vadd.f32 %v999_v36, %v466_v4  ;;  %vm493_vm0 = vcmp.gt.f32.partialorder %v999_v36, 0.0 }
 0xb62   : > { %v494_v38 = vsel %vm493_vm0, 1e+30, %v468_v10 }
 0xb63   : > { %v495_v39 = vsel %vm390_vm14, %v494_v38, inf }
 0xb64   : > { %496 = vmin.xlane.f32.xlu0 %v495_v39 }
 0xbf1   : > { %v497_v40 = vpop.xlane.xlu0 %496 }
 0xbf2   : > { %vm498_vm1 = vcmp.eq.f32.partialorder %v494_v38, %v497_v40 }
 0xbf3   : > { %v499_v41 = vsel %vm498_vm1, %v1244_v1, 64  ;;  %vm616_vm1 = vcmask 1043456  }
 0xbf4   : > { %v500_v42 = vsel %vm390_vm14, %v499_v41, 2147483647 }
 0xbf5   : > { %v502_v43 = vshra.s32 %v500_v42, 16  ;;  %v501_v45 = vand.u32 65535, %v500_v42 }
 0xbf7   : > { %v504_v44 = vcvt.s32.f32 %v502_v43  ;;  %v503_v47 = vcvt.s32.f32 %v501_v45 }
 0xbf9   : > { %505 = vmin.xlane.f32.xlu1 %v504_v44 }
 0xc86   : > { %v506_v46 = vpop.xlane.xlu1 %505 }
 0xc87   : > { %vm507_vm2 = vcmp.eq.f32.partialorder %v504_v44, %v506_v46  ;;  %v512_v49 = vcvt.f32.s32 %v506_v46  ;;  %v599_v46 = vmul.f32 %v272_v58, %v1267_v5 }
 0xc88   : > { %v508_v48 = vsel %vm507_vm2, %v503_v47, inf  ;;  %v603_v47 = vrot.slane %v1351_v23, 5  ;;  %vm618_vm2 = vcmask 1044480  }
 0xc89   : > { %509 = vmin.xlane.f32.xlu0 %v508_v48  ;;  %v513_v51 = vshll.u32 %v512_v49, 16  ;;  %v606_v48 = vrot.slane %v599_v46, 4 }
 0xc8a   : > { %v615_v49 = vsel %vm310_vm11, %v1267_v5, %v603_v47 }
 0xd16   : > { %v510_v50 = vpop.xlane.xlu0 %509 }
 0xd17   : > { %v511_v52 = vcvt.f32.s32 %v510_v50  ;;  %v602_v50 = vmul.f32 %v278_v0, %v1267_v5 }
 0xd19   : > { %v514_v53 = vadd.s32 %v513_v51, %v511_v52  ;;  %v617_v51 = vsel %vm616_vm1, %v615_v49, %v606_v48  ;;  %v609_v52 = vrot.slane %v602_v50, 3 }
 0xd1b   : > { %vm515_vm3 = vcmp.eq.s32.totalorder %v1244_v1, %v514_v53  ;;  %v611_v53 = vrot.slane %v1351_v23, 3 }
 0xd1c   : > { %v1000_v54 = vsel %vm515_vm3, 1.0, %v1215_v2  ;;  %vm620_vm3 = vcmask 1045504  }
 0xd1d   : > { %v518_v55 = vadd.f32 %v1000_v54, %v492_v37  ;;  %vm519_vm4 = vcmp.gt.f32.partialorder %v1000_v54, 0.0  ;;  %v613_v54 = vrot.slane %v599_v46, 2 }
 0xd1e   : > { %v520_v56 = vsel %vm519_vm4, 1e+30, %v494_v38  ;;  %vm622_vm4 = vcmask 1046528  }
 0xd1f   : > { %v521_v57 = vsel %vm390_vm14, %v520_v56, inf }
 0xd20   : > { %522 = vmin.xlane.f32.xlu1 %v521_v57 }
 0xdad   : > { %v523_v59 = vpop.xlane.xlu1 %522 }
 0xdae   : > { %vm524_vm5 = vcmp.eq.f32.partialorder %v520_v56, %v523_v59 }
 0xdaf   : > { %v525_v60 = vsel %vm524_vm5, %v1244_v1, 64 }
 0xdb0   : > { %v526_v61 = vsel %vm390_vm14, %v525_v60, 2147483647 }
 0xdb1   : > { %v528_v62 = vshra.s32 %v526_v61, 16  ;;  %v527_v6 = vand.u32 65535, %v526_v61 }
 0xdb3   : > { %v530_v63 = vcvt.s32.f32 %v528_v62  ;;  %v529_v8 = vcvt.s32.f32 %v527_v6 }
 0xdb5   : > { %531 = vmin.xlane.f32.xlu0 %v530_v63 }
 0xe42   : > { %v532_v7 = vpop.xlane.xlu0 %531 }
 0xe43   : > { %vm533_vm6 = vcmp.eq.f32.partialorder %v530_v63, %v532_v7  ;;  %v538_v11 = vcvt.f32.s32 %v532_v7 }
 0xe44   : > { %v534_v9 = vsel %vm533_vm6, %v529_v8, inf }
 0xe45   : > { %535 = vmin.xlane.f32.xlu1 %v534_v9  ;;  %v539_v13 = vshll.u32 %v538_v11, 16 }
 0xed2   : > { %v536_v12 = vpop.xlane.xlu1 %535 }
 0xed3   : > { %v537_v15 = vcvt.f32.s32 %v536_v12 }
 0xed5   : > { %v540_v19 = vadd.s32 %v539_v13, %v537_v15 }
 0xed7   : > { %vm541_vm7 = vcmp.eq.s32.totalorder %v1244_v1, %v540_v19 }
 0xed8   : > { %v1001_v20 = vsel %vm541_vm7, 1.0, %v1215_v2 }
 0xed9   : > { %v544_v21 = vadd.f32 %v1001_v20, %v518_v55  ;;  %vm545_vm8 = vcmp.gt.f32.partialorder %v1001_v20, 0.0  ;;  %v619_v55 = vsel %vm618_vm2, %v617_v51, %v609_v52 }
 0xeda   : > { %v546_v24 = vsel %vm545_vm8, 1e+30, %v520_v56  ;;  %v621_v58 = vsel %vm620_vm3, %v619_v55, %v611_v53 }
 0xedb   : > { %v547_v25 = vsel %vm390_vm14, %v546_v24, inf  ;;  %v623_v56 = vsel %vm622_vm4, %v621_v58, %v613_v54 }
 0xedc   : > { %548 = vmin.xlane.f32.xlu0 %v547_v25  ;;  %1021 = vmatprep.mubr.msk.f32.mxu1 %vm390_vm14, %v623_v56 }
 0xf69   : > { %v549_v4 = vpop.xlane.xlu0 %548 }
 0xf6a   : > { %vm550_vm9 = vcmp.eq.f32.partialorder %v546_v24, %v549_v4 }
 0xf6b   : > { %v551_v10 = vsel %vm550_vm9, %v1244_v1, 64 }
 0xf6c   : > { %v552_v14 = vsel %vm390_vm14, %v551_v10, 2147483647 }
 0xf6d   : > { %v554_v16 = vshra.s32 %v552_v14, 16  ;;  %v553_v18 = vand.u32 65535, %v552_v14 }
 0xf6f   : > { %v556_v17 = vcvt.s32.f32 %v554_v16  ;;  %v555_v27 = vcvt.s32.f32 %v553_v18  ;;  %v1199_v16 = vmov 0.4   ;;  %v1207_v18 = vmov 0.6  }
 0xf71   : > { %557 = vmin.xlane.f32.xlu1 %v556_v17 }
 0xffe   : > { %v558_v26 = vpop.xlane.xlu1 %557 }
 0xfff   : > { %vm559_vm10 = vcmp.eq.f32.partialorder %v556_v17, %v558_v26  ;;  %v564_v29 = vcvt.f32.s32 %v558_v26  ;;  %v1203_v17 = vmov 0.5  }
0x1000   : > { %v560_v28 = vsel %vm559_vm10, %v555_v27, inf }
0x1001   : > { %561 = vmin.xlane.f32.xlu0 %v560_v28  ;;  %v565_v31 = vshll.u32 %v564_v29, 16 }
0x108e   : > { %v562_v30 = vpop.xlane.xlu0 %561 }
0x108f   : > { %v563_v32 = vcvt.f32.s32 %v562_v30 }
0x1091   : > { %v566_v33 = vadd.s32 %v565_v31, %v563_v32 }
0x1093   : > { %vm567_vm12 = vcmp.eq.s32.totalorder %v1244_v1, %v566_v33 }
0x1094   : > { %v1002_v22 = vsel %vm567_vm12, 1.0, %v1215_v2 }
0x1095   : > { %vm571_vm13 = vcmp.gt.f32.partialorder %v1002_v22, 0.0  ;;  %v570_v34 = vadd.f32 %v1002_v22, %v544_v21 }
0x1096   : > { %v572_v35 = vsel %vm571_vm13, 1e+30, %v546_v24 }
0x1097   : > { %v573_v36 = vsel %vm390_vm14, %v572_v35, inf }
0x1098   : > { %574 = vmin.xlane.f32.xlu1 %v573_v36 }
0x1125   : > { %v575_v37 = vpop.xlane.xlu1 %574 }
0x1126   : > { %vm576_vm15 = vcmp.eq.f32.partialorder %v572_v35, %v575_v37 }
0x1127   : > { %v577_v38 = vsel %vm576_vm15, %v1244_v1, 64 }
0x1128   : > { %v578_v39 = vsel %vm390_vm14, %v577_v38, 2147483647 }
0x1129   : > { %v580_v40 = vshra.s32 %v578_v39, 16  ;;  %v579_v42 = vand.u32 65535, %v578_v39 }
0x112b   : > { %v582_v41 = vcvt.s32.f32 %v580_v40  ;;  %v581_v44 = vcvt.s32.f32 %v579_v42 }
0x112d   : > { %583 = vmin.xlane.f32.xlu0 %v582_v41 }
0x11ba   : > { %v584_v43 = vpop.xlane.xlu0 %583 }
0x11bb   : > { %vm585_vm0 = vcmp.eq.f32.partialorder %v582_v41, %v584_v43  ;;  %v590_v57 = vcvt.f32.s32 %v584_v43 }
0x11bc   : > { %v586_v45 = vsel %vm585_vm0, %v581_v44, inf }
0x11bd   : > { %587 = vmin.xlane.f32.xlu1 %v586_v45  ;;  %v591_v60 = vshll.u32 %v590_v57, 16 }
0x124a   : > { %v588_v59 = vpop.xlane.xlu1 %587 }
0x124b   : > { %v589_v61 = vcvt.f32.s32 %v588_v59 }
0x124d   : > { %v592_v62 = vadd.s32 %v591_v60, %v589_v61 }
0x124f   : > { %vm593_vm11 = vcmp.eq.s32.totalorder %v1244_v1, %v592_v62 }
0x1250   : > { %v1003_v5 = vsel %vm593_vm11, 1.0, %v1215_v2 }
0x1251   : > { %v596_v0 = vadd.f32 %v1003_v5, %v570_v34 }
0x1253   : > { %1019 = vmatprep.subr.msk.mxu1 %vm390_vm14, %v596_v0 }
0x1254   : > { %1020 = vmatpush3.xpose.msk.msra.mxu1 %vm390_vm14, %v596_v0 }
0x1257   : > { %1022 = vmatmul.mubr.msk.f32.vlgmr.msra.gmra.mrb[0].mxu1 %vm390_vm14, %v303_v3 }
0x132a   : > { %v1023_v63 = vpop.f32.mrb[0].mxu1 }
0x132b   : > { %v698_v6 = vpop.f32.mrb[1].mxu1 }
0x132c   : > { %v708_v7 = vmul.f32 0.125, %v698_v6 }
0x132e   : > { %v709_v8 = vmul.f32 8.0, %v708_v7  ;;  %v716_v9 = vrot.slane %v708_v7, 1  ;;  %v723_v11 = vrot.slane %v708_v7, 2 }
0x1330   : > { %v710_v12 = vmul.f32 %v709_v8, %v708_v7  ;;  %v718_v13 = vmul.f32 %v716_v9, %v709_v8  ;;  %v725_v1 = vmul.f32 %v723_v11, %v709_v8 }
0x1332   : > { %v712_v15 = vrot.slane %v710_v12, 5  ;;  %v720_v2 = vrot.slane %v718_v13, 4  ;;  %v727_v19 = vrot.slane %v725_v1, 3  ;;  %v730_v20 = vrot.slane %v710_v12, 3 }
0x1333   : > { %v733_v21 = vrot.slane %v718_v13, 2  ;;  %v736_v24 = vrot.slane %v710_v12, 2 }
0x1334   : > { %v1415_v25 = vsub.f32 %v698_v6, %v712_v15  ;;  %v1417_v23 = vsub.f32 %v698_v6, %v720_v2  ;;  %v729_v3 = vsub.f32 %v698_v6, %v727_v19  ;;  %v732_v4 = vsub.f32 %v698_v6, %v730_v20 }
0x1335   : > { %v735_v10 = vsub.f32 %v698_v6, %v733_v21  ;;  %v738_v14 = vsub.f32 %v1023_v63, %v736_v24 }
0x1336 LB: >> { %v748_v26 = vmul.f32 %v1209_v18, %v1415_v25  ;;  %v749_v27 = vmul.f32 %v1205_v17, %v1417_v23  ;;  %v754_v28 = vmul.f32 %v1201_v16, %v729_v3  ;;  %v760_v29 = vrot.slane %v1209_v18, 7  ;;  %s744_s22 = sadd.s32 1, %s1213_s22   ;;  %s1213_s22 = sphi %s1419_s22, %s744_s22   ;;  %v1209_v18 = vphi %v1207_v18, %v1208_v18   ;;  %v1205_v17 = vphi %v1203_v17, %v1204_v17   ;;  %v1201_v16 = vphi %v1199_v16, %v1200_v16  }
0x1337   : >> { %v764_v30 = vrot.slane %v1205_v17, 6  ;;  %v772_v31 = vrot.slane %v1201_v16, 6  ;;  %v779_v32 = vrot.slane %v1209_v18, 6  ;;  %v782_v33 = vrot.slane %v1205_v17, 5  ;;  %p741_p5 = scmp.ge.s32.totalorder %s744_s22, 32  }
0x1338   : >> { %v751_v22 = vrot.slane %v749_v27, 1  ;;  %v756_v34 = vrot.slane %v754_v28, 2  ;;  %v762_v35 = vmul.f32 %v760_v29, %v1417_v23  ;;  %v789_v36 = vrot.slane %v1201_v16, 5  ;;  %v817_v6 = vld [vmem:[%s1259_s20] sm:$0x7] (%p741_p5) }
0x1339   : >> { %v766_v37 = vmul.f32 %v764_v30, %v732_v4  ;;  %v774_v38 = vmul.f32 %v772_v31, %v735_v10  ;;  %v781_v39 = vmul.f32 %v779_v32, %v729_v3  ;;  %v784_v40 = vmul.f32 %v782_v33, %v735_v10 }
0x133a   : >> { %v753_v41 = vadd.f32 %v751_v22, %v748_v26  ;;  %v791_v42 = vmul.f32 %v789_v36, %v738_v14  ;;  %v838_v7 = vmul.f32 (%p741_p5), %v817_v6, %v817_v6  ;;  %vm882_vm8 = vcmask (%p741_p5), 57344  }
0x133b   : >> { %v768_v43 = vrot.slane %v766_v37, 2  ;;  %v776_v44 = vrot.slane %v774_v38, 3  ;;  %v786_v45 = vrot.slane %v784_v40, 2  ;;  %vm888_vm9 = vcmask (%p741_p5), 0  }
0x133c   : >> { %v793_v46 = vrot.slane %v791_v42, 3  ;;  %v758_v47 = vadd.f32 %v756_v34, %v753_v41  ;;  %v840_v12 = vrot.slane (%p741_p5), %v838_v7, 1  ;;  %v843_v13 = vrot.slane (%p741_p5), %v838_v7, 2 }
0x133d   : >> { %v770_v48 = vadd.f32 %v768_v43, %v762_v35  ;;  %v788_v49 = vadd.f32 %v786_v45, %v781_v39 }
0x133e   : >> { %v796_v52 = vmul.f32 %v758_v47, %v758_v47  ;;  %v842_v2 = vadd.f32 (%p741_p5), %v840_v12, %v838_v7 }
0x133f   : >> { %v778_v50 = vadd.f32 %v776_v44, %v770_v48  ;;  %v795_v51 = vadd.f32 %v793_v46, %v788_v49 }
0x1340   : > { %v845_v20 = vadd.f32 (%p741_p5), %v843_v13, %v842_v2 }
0x1341   : >> { %v797_v53 = vmul.f32 %v778_v50, %v778_v50  ;;  %v802_v54 = vmul.f32 %v795_v51, %v795_v51 }
0x1342   : > { %vm848_vm14 = vcmp.eq.f32.partialorder (%p741_p5), %v845_v20, inf  ;;  %v851_v25 = vand.u32 (%p741_p5), 2147483648, %v845_v20  ;;  %vm850_vm6 = vcmp.eq.f32.partialorder (%p741_p5), %v845_v20, 0.0 }
0x1343   : >> { %v799_v55 = vrot.slane %v797_v53, 1  ;;  %v804_v58 = vrot.slane %v802_v54, 2 }
0x1345   : >> { %v801_v56 = vadd.f32 %v799_v55, %v796_v52 }
0x1347   : >> { %v806_v57 = vadd.f32 %v804_v58, %v801_v56 }
0x1349   : >> { %v807_v59 = vadd.f32 1e-30, %v806_v57 }
0x134b   : >> { %1117 = vrsqrt.f32 %v807_v59 }
0x134c   : > { %1119 = vrsqrt.f32 (%p741_p5), %v845_v20 }
0x1354   : > { %743 = sbr.rel (!%p741_p5) target bundleno = 4918 (0x1336), region = 86 }
0x1355   : >> { %v1118_v60 = vpop.eup %1117 }
0x1356   : >> { %v809_v61 = vmul.f32 %v1118_v60, %v758_v47   ;;  %v811_v62 = vrot.slane %v1118_v60, 7  ;;  %v814_v5 = vrot.slane %v1118_v60, 6  ;;  %v1120_v24 = vpop.eup (%p741_p5), %1119 }
0x1358   : >> { %v813_v0 = vmul.f32 %v811_v62, %v778_v50   ;;  %v816_v63 = vmul.f32 %v814_v5, %v795_v51   ;;  %v1208_v18 = vmov %v809_v61   ;;  %v853_v8 = vmul.f32 (%p741_p5), %v809_v61, %v809_v61 }
0x1359   : > { %v819_v28 = vrot.slane (%p741_p5), %v809_v61, 3 }
0x135a   : >> { %v1200_v16 = vmov %v816_v63   ;;  %v1204_v17 = vmov %v813_v0   ;;  %v854_v9 = vmul.f32 (%p741_p5), %v813_v0, %v813_v0  ;;  %v859_v11 = vmul.f32 (%p741_p5), %v816_v63, %v816_v63 }
0x135b   : > { %v847_v17 = vmul.f32 %v1120_v24, %v845_v20  ;;  %v823_v4 = vrot.slane %v813_v0, 3  ;;  %v831_v30 = vrot.slane %v816_v63, 3  ;;  %v821_v33 = vmul.f32 %v819_v28, %v817_v6 }
0x135c   : > { %v856_v1 = vrot.slane %v854_v9, 1  ;;  %v861_v15 = vrot.slane %v859_v11, 2 }
0x135d   : > { %v849_v10 = vsel %vm848_vm14, %v845_v20, %v847_v17  ;;  %v825_v29 = vmul.f32 %v823_v4, %v817_v6  ;;  %v833_v34 = vmul.f32 %v831_v30, %v817_v6 }
0x135e   : > { %v858_v19 = vadd.f32 %v856_v1, %v853_v8  ;;  %v852_v18 = vsel %vm850_vm6, %v851_v25, %v849_v10 }
0x135f   : > { %v827_v22 = vrot.slane %v825_v29, 1  ;;  %v835_v36 = vrot.slane %v833_v34, 2 }
0x1360   : > { %v863_v21 = vadd.f32 %v861_v15, %v858_v19 }
0x1361   : > { %v829_v35 = vadd.f32 %v827_v22, %v821_v33 }
0x1362   : > { %1121 = vrsqrt.f32 %v863_v21  ;;  %vm866_vm5 = vcmp.eq.f32.partialorder %v863_v21, inf  ;;  %v869_v23 = vand.u32 2147483648, %v863_v21  ;;  %vm868_vm7 = vcmp.eq.f32.partialorder %v863_v21, 0.0 }
0x1363   : > { %v837_v37 = vadd.f32 %v835_v36, %v829_v35 }
0x136c   : > { %v1122_v16 = vpop.eup %1121 }
0x136d   : > { %v865_v3 = vmul.f32 %v1122_v16, %v863_v21 }
0x136f   : > { %v867_v14 = vsel %vm866_vm5, %v863_v21, %v865_v3 }
0x1370   : > { %v870_v26 = vsel %vm868_vm7, %v869_v23, %v867_v14 }
0x1371   : > { %v872_v27 = vrot.slane %v870_v26, 3 }
0x1373   : > { %v874_v31 = vmul.f32 %v872_v27, %v852_v18 }
0x1375   : > { %v875_v32 = vmax.f32 %v874_v31, 1e-08 }
0x1377   : > { %1123 = vrcp.f32 %v875_v32 }
0x1381   : > { %v1124_v38 = vpop.eup %1123 }
0x1382   : > { %v877_v39 = vmul.f32 %v1124_v38, %v837_v37 }
0x1384   : > { %v878_v40 = vand.u32 2147483647, %v877_v39 }
0x1386   : > { %v879_v41 = vadd.f32 1e-06, %v878_v40 }
0x1388   : > { %1125 = vlog2.f32 %v879_v41 }
0x1392   : > { %v1126_v42 = vpop.eup %1125 }
0x1393   : > { %v881_v43 = vmul.f32 0.6931472, %v1126_v42 }
0x1395   : > { %v883_v44 = vsel %vm882_vm8, %v881_v43, 0.0 }
0x1396   : > { %884 = vadd.xlane.f32.xlu0 %v883_v44 }
0x1423   : > { %v885_v45 = vpop.xlane.xlu0 %884 }
0x1424   : > { %v886_v46 = vsub.f32 0.0, %v885_v45 }
0x1426   : > { %v887_v47 = vmul.f32 0.125, %v886_v46 }
0x1428   : > { %889 = vst.msk [vmem:[%s153_s14] sm:$0x1] %vm888_vm9, %v887_v47 }
0x1429 PF: > { %s12_s9 = sadd.s32 1, %s1173_s9  }
0x142a   : > { %p9_p6 = scmp.ge.s32.totalorder %s12_s9, 4  }
0x142c   :  { %11 = sbr.rel (!%p9_p6) target bundleno = 1 (0x1), region = 97 }

</bundles_post_ra>
